<compile_context>
chip_gen: v6e
topology: v6e:2x2x1
jax: 0.10.0
libtpu: 0.0.40
codegen_flags: <defaults>
</compile_context>

<pallas_src>
import functools
import math

import jax
import jax.numpy as jnp
from jax.experimental import pallas as pl
from jax.experimental.pallas import tpu as pltpu


def _round_up(v, m):
    return ((v + m - 1) // m) * m


def _probe_weight_pipeline_mode():
    """pl.Buffered(1) single-buffers grid-invariant weight tiles (halves their
    resident VMEM). Probe construction so an older BlockSpec signature simply
    degrades to default double-buffering instead of failing."""
    try:
        mode = pl.Buffered(1)
        pl.BlockSpec((8, 128), lambda i: (0, 0), pipeline_mode=mode)
        return mode
    except Exception:
        return None


_WEIGHT_PIPELINE = _probe_weight_pipeline_mode()


def _vmem_capacity_bytes():
    try:
        cap = getattr(pltpu.get_tpu_info(), "vmem_capacity_bytes", None)
        if cap:
            return int(cap)
    except Exception:
        pass
    return 64 * 1024 * 1024  # conservative default (v7x per-core VMEM)


def _gate_dtype(compute_dtype):
    """bf16 gate math on v6e/v7x (native bf16 VPU/EUP); f32 on v5e and older."""
    if jnp.dtype(compute_dtype) == jnp.dtype(jnp.float32):
        return jnp.float32
    try:
        kind = jax.devices()[0].device_kind.lower()
        if any(tag in kind for tag in ("v2", "v3", "v4", "v5")):
            return jnp.float32
    except Exception:
        pass
    return compute_dtype


def _ssm_block_kernel(x_ref, w_ssm_ref, b_ssm_ref, w_gate_ref, b_gate_ref,
                      ct_ref, wout_ref, o_ref, *, inv_d_model, compute_dtype,
                      gate_dtype):
    """Fused LayerNorm -> in_proj -> (degenerate) SelectiveSSM -> SiLU gate
    -> out_proj -> residual for one (tm, d_model_padded) row tile.

    ln_w/ln_b are pre-folded into the in_proj weights/biases; D is pre-folded
    into ct_ref = C^T + diag(D).
    """
    x = x_ref[...].astype(jnp.float32)                        # (tm, dmp)

    # Single-pass LayerNorm statistics over the true d_model columns.
    # Zero-padded feature columns contribute 0 to both sums, so no correction.
    s = jnp.sum(x, axis=-1, keepdims=True)
    ss = jnp.sum(x * x, axis=-1, keepdims=True)
    mean = s * inv_d_model
    var = ss * inv_d_model - mean * mean
    xn = (x - mean) * jax.lax.rsqrt(var + 1e-5)
    xn_c = xn.astype(compute_dtype)

    # in_proj as two contiguous-output dots (no lane-boundary slice).
    x_ssm = jnp.dot(xn_c, w_ssm_ref[...],
                    preferred_element_type=jnp.float32) + b_ssm_ref[...]
    x_gate = jnp.dot(xn_c, w_gate_ref[...],
                     preferred_element_type=jnp.float32) + b_gate_ref[...]

    # SelectiveSSM reachable (non-CUDA) branch with D folded into C^T:
    #   y_ssm = x_ssm @ C^T + x_ssm * D = x_ssm @ (C^T + diag(D)).
    # TODO(synk): the recurrent state h (A_bar / B_bar / u_B path) is dead
    # code in the reference's reachable branch, so it is not computed.
    y_ssm = jnp.dot(x_ssm.astype(compute_dtype), ct_ref[...],
                    preferred_element_type=jnp.float32)

    # Gating: y_ssm * silu(x_gate)   (bf16 on v6e/v7x, f32 on v5e).
    g = x_gate.astype(gate_dtype)
    y_gated = y_ssm.astype(gate_dtype) * (g * jax.nn.sigmoid(g))

    # out_proj + residual (residual stays f32).
    y = jnp.dot(y_gated.astype(compute_dtype), wout_ref[...],
                preferred_element_type=jnp.float32)
    o_ref[...] = (x + y).astype(o_ref.dtype)


def selective_ssm_block(x, params, *, tm=None, compute_dtype=jnp.bfloat16,
                        single_buffer_weights=True):
    """x: (B, L, d_model). Returns (B, L, d_model) in x.dtype."""
    B, L, d_model = x.shape
    d_inner = params["win"].shape[0] // 2
    assert params["C"].shape == (d_inner, d_inner), (
        "reference broadcast `y + u*D` requires d_state == d_inner")
    M = B * L
    f32 = jnp.float32

    vmem_cap = _vmem_capacity_bytes()
    gate_dtype = _gate_dtype(compute_dtype)

    # ---- lane-dense feature padding + row-tile selection ------------------
    dmp = _round_up(d_model, 128)
    dip = _round_up(d_inner, 128)

    if tm is None:
        tm = 512 if vmem_cap >= (100 << 20) else 256      # v5e/v6e vs v7x
    tm = max(8, _round_up(min(int(tm), 1024), 8))
    tm = min(tm, max(8, _round_up(M, 8)))
    # Keep enough grid depth to pipeline DMAs / shard across TensorCores.
    while tm > 64 and M // tm < 8:
        tm //= 2
    tm = max(8, (tm // 8) * 8)
    # Prefer a tile that divides M exactly -> no row padding / output slice.
    for cand in range(tm, 7, -8):
        if M % cand == 0:
            tm = cand
            break
    Mp = _round_up(M, tm)

    # ---- input packing: skip the pad (an extra full HBM round trip) when the
    # shapes are already tile-aligned (the common production case).
    x2 = x.reshape(M, d_model)
    padded = (Mp != M) or (dmp != d_model)
    if padded:
        x2 = jnp.pad(x2, ((0, Mp - M), (0, dmp - d_model)))

    # ---- weights: fold ln_w into in_proj, ln_b into per-half biases, D into
    # C^T; pre-transpose, pad lane-dense, cast to the MXU compute dtype.
    ln_w = params["ln_w"].astype(f32)
    ln_b = params["ln_b"].astype(f32)
    win = params["win"].astype(f32)                        # (2*d_inner, d_model)
    w_ssm_t = win[:d_inner].T * ln_w[:, None]              # (d_model, d_inner)
    w_gate_t = win[d_inner:].T * ln_w[:, None]
    b_ssm = ln_b @ win[:d_inner].T                         # (d_inner,)
    b_gate = ln_b @ win[d_inner:].T
    ct = params["C"].astype(f32).T + jnp.diag(params["D"].astype(f32))
    wout_t = params["wout"].astype(f32).T                  # (d_inner, d_model)

    def pad2(a, r, c):
        if a.shape == (r, c):
            return a
        return jnp.pad(a, ((0, r - a.shape[0]), (0, c - a.shape[1])))

    w_ssm_t = pad2(w_ssm_t, dmp, dip).astype(compute_dtype)
    w_gate_t = pad2(w_gate_t, dmp, dip).astype(compute_dtype)
    ct = pad2(ct, dip, dip).astype(compute_dtype)
    wout_t = pad2(wout_t, dip, dmp).astype(compute_dtype)
    b_ssm = jnp.pad(b_ssm, (0, dip - d_inner)).reshape(1, dip)
    b_gate = jnp.pad(b_gate, (0, dip - d_inner)).reshape(1, dip)

    # ---- generation-aware VMEM budget --------------------------------------
    # Weights resident (optionally single-buffered); in/out row tiles
    # double-buffered; f32/bf16 intermediates counted once.
    # TODO(synk): if resident weights approach ~half of vmem_cap (very large
    # d_model/d_inner), switch to a K/N-tiled "arbitrary" reduction grid.
    wbytes = jnp.dtype(compute_dtype).itemsize
    io_bytes = jnp.dtype(x.dtype).itemsize
    gbytes = jnp.dtype(gate_dtype).itemsize
    weight_bytes = (2 * dmp * dip + dip * dip + dip * dmp) * wbytes + 2 * dip * 4
    n_weight_buf = 1 if (single_buffer_weights and _WEIGHT_PIPELINE is not None) else 2
    act_bytes = 2 * tm * dmp * io_bytes * 2                 # in + out, double-buffered
    interm_bytes = (tm * dmp * (3 * 4 + wbytes)             # x, xn, y (f32) + xn_c
                    + tm * dip * (3 * 4 + wbytes + 2 * gbytes))
    budget = n_weight_buf * weight_bytes + act_bytes + interm_bytes
    vmem_limit = int(min(max(int(budget * 1.25), 32 << 20), int(vmem_cap * 0.9)))

    flops = 2 * Mp * (2 * dmp * dip + dip * dip + dip * dmp)
    transcendentals = Mp * (dip + 1)                        # sigmoid + rsqrt per row
    bytes_accessed = Mp * dmp * 2 * io_bytes + weight_bytes

    kernel = functools.partial(_ssm_block_kernel, inv_d_model=1.0 / d_model,
                               compute_dtype=compute_dtype, gate_dtype=gate_dtype)

    pipeline_mode = _WEIGHT_PIPELINE if single_buffer_weights else None

    def full(a):
        if pipeline_mode is not None:
            return pl.BlockSpec(a.shape, lambda i: (0, 0),
                                pipeline_mode=pipeline_mode)
        return pl.BlockSpec(a.shape, lambda i: (0, 0))

    out = pl.pallas_call(
        kernel,
        out_shape=jax.ShapeDtypeStruct((Mp, dmp), x.dtype),
        grid_spec=pltpu.PrefetchScalarGridSpec(
            num_scalar_prefetch=0,
            grid=(Mp // tm,),
            in_specs=[
                pl.BlockSpec((tm, dmp), lambda i: (i, 0)),   # x row tile
                full(w_ssm_t), full(b_ssm),                  # in_proj (ssm half)
                full(w_gate_t), full(b_gate),                # in_proj (gate half)
                full(ct), full(wout_t),                      # C^T+diag(D), out_proj^T
            ],
            out_specs=pl.BlockSpec((tm, dmp), lambda i: (i, 0)),
        ),
        compiler_params=pltpu.CompilerParams(
            dimension_semantics=("parallel",),
            vmem_limit_bytes=vmem_limit),
        cost_estimate=pl.CostEstimate(flops=flops,
                                      transcendentals=transcendentals,
                                      bytes_accessed=bytes_accessed),
    )(x2, w_ssm_t, b_ssm, w_gate_t, b_gate, ct, wout_t)

    if padded:
        out = out[:M, :d_model]
    return out.reshape(B, L, d_model)


def reference_forward(x, params):
    """Pure-JAX (f32) mirror of the reachable (non-CUDA) PyTorch forward."""
    d_inner = params["win"].shape[0] // 2
    mean = x.mean(-1, keepdims=True)
    var = ((x - mean) ** 2).mean(-1, keepdims=True)
    xn = (x - mean) / jnp.sqrt(var + 1e-5) * params["ln_w"] + params["ln_b"]
    xp = xn @ params["win"].T
    x_ssm, x_gate = xp[..., :d_inner], xp[..., d_inner:]
    u_c = x_ssm @ params["C"].T
    y_ssm = u_c + x_ssm * params["D"]
    y_gated = y_ssm * (x_gate * jax.nn.sigmoid(x_gate))
    y = y_gated @ params["wout"].T
    return x + y


if __name__ == "__main__":
    key = jax.random.PRNGKey(0)

    def make_params(k, d_model, d_inner):
        k1, k2, k3, k4, k5, k6 = jax.random.split(k, 6)
        d_state = d_inner  # the reference's `y + u*D` broadcast requires this
        return {
            "ln_w": 1.0 + 0.1 * jax.random.normal(k1, (d_model,), jnp.float32),
            "ln_b": 0.05 * jax.random.normal(k2, (d_model,), jnp.float32),
            "win": jax.random.normal(k3, (2 * d_inner, d_model), jnp.float32)
                   / math.sqrt(d_model),
            "C": jax.random.normal(k4, (d_state, d_inner), jnp.float32)
                 / math.sqrt(d_state),
            "D": jax.random.normal(k5, (d_inner,), jnp.float32),
            "wout": jax.random.normal(k6, (d_model, d_inner), jnp.float32)
                    / math.sqrt(d_inner),
        }

    def make_runner(compute_dtype):
        fast = jax.jit(functools.partial(selective_ssm_block,
                                         compute_dtype=compute_dtype))
        safe = jax.jit(functools.partial(selective_ssm_block,
                                         compute_dtype=compute_dtype,
                                         single_buffer_weights=False))

        def run(xv, pv):
            try:
                return fast(xv, pv)
            except Exception:
                # Fallback if the installed jax rejects pl.Buffered(1) for the
                # grid-invariant weight tiles at lowering time.
                return safe(xv, pv)
        return run

    block_bf16 = make_runner(jnp.bfloat16)
    block_f32 = make_runner(jnp.float32)

    # --- small shapes implied by the module (d_model=32 -> d_inner=64=d_state)
    batch, seq_len, d_model = 2, 8, 32
    d_inner = d_model * 2
    kp, kx, kp2, kx2 = jax.random.split(key, 4)
    params = make_params(kp, d_model, d_inner)
    x = jax.random.normal(kx, (batch, seq_len, d_model), jnp.float32)
    ref = reference_forward(x, params)

    # f32-compute path: tight structural check of the fused math.
    out_f32 = jax.block_until_ready(block_f32(x, params))
    assert out_f32.shape == x.shape
    assert jnp.allclose(out_f32, ref, atol=1e-3, rtol=1e-3), "f32 kernel mismatch"

    # bf16-MXU path (performance default): bf16 operand rounding tolerance.
    out_bf16 = jax.block_until_ready(block_bf16(x, params))
    assert jnp.allclose(out_bf16, ref, atol=1e-1, rtol=1e-1), "bf16 kernel mismatch"

    # --- lane-dense multi-tile shapes (no pad/slice path, tm divides B*L) ----
    b2, l2, dm2 = 2, 256, 128
    di2 = dm2 * 2
    params2 = make_params(kp2, dm2, di2)
    x_big = jax.random.normal(kx2, (b2, l2, dm2), jnp.float32)
    ref2 = reference_forward(x_big, params2)
    out2 = jax.block_until_ready(block_bf16(x_big, params2))
    assert out2.shape == x_big.shape
    assert jnp.allclose(out2, ref2, atol=1e-1, rtol=1e-1), "bf16 kernel mismatch (big)"

    print("KERNEL_OK")
</pallas_src>

<mosaic_0001>
module attributes {stable_mosaic.version = 11 : i64} {
  func.func @_ssm_block_kernel(%arg0: i32, %arg1: memref<16x128xf32, #tpu.memory_space<vmem>>, %arg2: memref<128x128xf32, #tpu.memory_space<vmem>>, %arg3: memref<1x128xf32, #tpu.memory_space<vmem>>, %arg4: memref<128x128xf32, #tpu.memory_space<vmem>>, %arg5: memref<1x128xf32, #tpu.memory_space<vmem>>, %arg6: memref<128x128xf32, #tpu.memory_space<vmem>>, %arg7: memref<128x128xf32, #tpu.memory_space<vmem>>, %arg8: memref<16x128xf32, #tpu.memory_space<vmem>>) attributes {dimension_semantics = [#tpu.dimension_semantics<parallel>], iteration_bounds = array<i64: 1>, scalar_prefetch = 0 : i64, scratch_operands = 0 : i64, tpu.core_type = #tpu.core_type<tc>, window_params = [{transform_indices = @transform_0, window_bounds = array<i64: 16, 128>}, {pipeline_mode = #tpu.pipeline_mode<synchronous>, transform_indices = @transform_1, window_bounds = array<i64: 128, 128>}, {pipeline_mode = #tpu.pipeline_mode<synchronous>, transform_indices = @transform_2, window_bounds = array<i64: 1, 128>}, {pipeline_mode = #tpu.pipeline_mode<synchronous>, transform_indices = @transform_3, window_bounds = array<i64: 128, 128>}, {pipeline_mode = #tpu.pipeline_mode<synchronous>, transform_indices = @transform_4, window_bounds = array<i64: 1, 128>}, {pipeline_mode = #tpu.pipeline_mode<synchronous>, transform_indices = @transform_5, window_bounds = array<i64: 128, 128>}, {pipeline_mode = #tpu.pipeline_mode<synchronous>, transform_indices = @transform_6, window_bounds = array<i64: 128, 128>}, {transform_indices = @transform_7, window_bounds = array<i64: 16, 128>}]} {
    %c0 = arith.constant 0 : index
    %c0_0 = arith.constant 0 : index
    %0 = vector.load %arg1[%c0, %c0_0] : memref<16x128xf32, #tpu.memory_space<vmem>>, vector<16x128xf32>
    %cst = arith.constant dense<0.000000e+00> : vector<16xf32>
    %1 = vector.multi_reduction <add>, %0, %cst [1] : vector<16x128xf32> to vector<16xf32>
    %2 = vector.shape_cast %1 : vector<16xf32> to vector<16x1xf32>
    %3 = arith.mulf %0, %0 : vector<16x128xf32>
    %cst_1 = arith.constant dense<0.000000e+00> : vector<16xf32>
    %4 = vector.multi_reduction <add>, %3, %cst_1 [1] : vector<16x128xf32> to vector<16xf32>
    %5 = vector.shape_cast %4 : vector<16xf32> to vector<16x1xf32>
    %cst_2 = arith.constant 3.125000e-02 : f32
    %6 = vector.broadcast %cst_2 : f32 to vector<16x1xf32>
    %7 = arith.mulf %2, %6 : vector<16x1xf32>
    %cst_3 = arith.constant 3.125000e-02 : f32
    %8 = vector.broadcast %cst_3 : f32 to vector<16x1xf32>
    %9 = arith.mulf %5, %8 : vector<16x1xf32>
    %10 = arith.mulf %7, %7 : vector<16x1xf32>
    %11 = arith.subf %9, %10 : vector<16x1xf32>
    %12 = vector.broadcast %7 : vector<16x1xf32> to vector<16x128xf32>
    %13 = arith.subf %0, %12 : vector<16x128xf32>
    %cst_4 = arith.constant 9.99999974E-6 : f32
    %14 = vector.broadcast %cst_4 : f32 to vector<16x1xf32>
    %15 = arith.addf %11, %14 : vector<16x1xf32>
    %16 = math.rsqrt %15 : vector<16x1xf32>
    %17 = vector.broadcast %16 : vector<16x1xf32> to vector<16x128xf32>
    %18 = arith.mulf %13, %17 : vector<16x128xf32>
    %c0_5 = arith.constant 0 : index
    %c0_6 = arith.constant 0 : index
    %19 = vector.load %arg2[%c0_5, %c0_6] : memref<128x128xf32, #tpu.memory_space<vmem>>, vector<128x128xf32>
    %cst_7 = arith.constant dense<0.000000e+00> : vector<16x128xf32>
    %20 = tpu.matmul %18, %19, %cst_7 {dimension_numbers = #tpu.dot_dimension_numbers<[1], [0], [0], [1], [0, 0, 1, 1], [], []>} : vector<16x128xf32>, vector<128x128xf32>, vector<16x128xf32> -> vector<16x128xf32>
    %c0_8 = arith.constant 0 : index
    %c0_9 = arith.constant 0 : index
    %21 = vector.load %arg3[%c0_8, %c0_9] : memref<1x128xf32, #tpu.memory_space<vmem>>, vector<1x128xf32>
    %22 = vector.broadcast %21 : vector<1x128xf32> to vector<16x128xf32>
    %23 = arith.addf %20, %22 : vector<16x128xf32>
    %c0_10 = arith.constant 0 : index
    %c0_11 = arith.constant 0 : index
    %24 = vector.load %arg4[%c0_10, %c0_11] : memref<128x128xf32, #tpu.memory_space<vmem>>, vector<128x128xf32>
    %cst_12 = arith.constant dense<0.000000e+00> : vector<16x128xf32>
    %25 = tpu.matmul %18, %24, %cst_12 {dimension_numbers = #tpu.dot_dimension_numbers<[1], [0], [0], [1], [0, 0, 1, 1], [], []>} : vector<16x128xf32>, vector<128x128xf32>, vector<16x128xf32> -> vector<16x128xf32>
    %c0_13 = arith.constant 0 : index
    %c0_14 = arith.constant 0 : index
    %26 = vector.load %arg5[%c0_13, %c0_14] : memref<1x128xf32, #tpu.memory_space<vmem>>, vector<1x128xf32>
    %27 = vector.broadcast %26 : vector<1x128xf32> to vector<16x128xf32>
    %28 = arith.addf %25, %27 : vector<16x128xf32>
    %c0_15 = arith.constant 0 : index
    %c0_16 = arith.constant 0 : index
    %29 = vector.load %arg6[%c0_15, %c0_16] : memref<128x128xf32, #tpu.memory_space<vmem>>, vector<128x128xf32>
    %cst_17 = arith.constant dense<0.000000e+00> : vector<16x128xf32>
    %30 = tpu.matmul %23, %29, %cst_17 {dimension_numbers = #tpu.dot_dimension_numbers<[1], [0], [0], [1], [0, 0, 1, 1], [], []>} : vector<16x128xf32>, vector<128x128xf32>, vector<16x128xf32> -> vector<16x128xf32>
    %31 = arith.negf %28 : vector<16x128xf32>
    %32 = math.exp %31 : vector<16x128xf32>
    %cst_18 = arith.constant 1.000000e+00 : f32
    %33 = vector.broadcast %cst_18 : f32 to vector<16x128xf32>
    %34 = arith.addf %33, %32 : vector<16x128xf32>
    %35 = arith.divf %33, %34 : vector<16x128xf32>
    %36 = arith.mulf %28, %35 : vector<16x128xf32>
    %37 = arith.mulf %30, %36 : vector<16x128xf32>
    %c0_19 = arith.constant 0 : index
    %c0_20 = arith.constant 0 : index
    %38 = vector.load %arg7[%c0_19, %c0_20] : memref<128x128xf32, #tpu.memory_space<vmem>>, vector<128x128xf32>
    %cst_21 = arith.constant dense<0.000000e+00> : vector<16x128xf32>
    %39 = tpu.matmul %37, %38, %cst_21 {dimension_numbers = #tpu.dot_dimension_numbers<[1], [0], [0], [1], [0, 0, 1, 1], [], []>} : vector<16x128xf32>, vector<128x128xf32>, vector<16x128xf32> -> vector<16x128xf32>
    %40 = arith.addf %0, %39 : vector<16x128xf32>
    %c0_22 = arith.constant 0 : index
    %c0_23 = arith.constant 0 : index
    %41 = vector.load %arg8[%c0_22, %c0_23] : memref<16x128xf32, #tpu.memory_space<vmem>>, vector<16x128xf32>
    tpu.vector_store %arg8[%c0_22, %c0_23], %40 {strides = array<i32>} : memref<16x128xf32, #tpu.memory_space<vmem>>, vector<16x128xf32>,
    return
  }
  func.func @transform_0(%arg0: i32) -> (i32, i32) {
    %c0_i32 = arith.constant 0 : i32
    %c0_i32_0 = arith.constant 0 : i32
    return %arg0, %c0_i32 : i32, i32
  }
  func.func @transform_1(%arg0: i32) -> (i32, i32) {
    %c0_i32 = arith.constant 0 : i32
    %c0_i32_0 = arith.constant 0 : i32
    %c0_i32_1 = arith.constant 0 : i32
    return %c0_i32, %c0_i32_0 : i32, i32
  }
  func.func @transform_2(%arg0: i32) -> (i32, i32) {
    %c0_i32 = arith.constant 0 : i32
    %c0_i32_0 = arith.constant 0 : i32
    %c0_i32_1 = arith.constant 0 : i32
    return %c0_i32, %c0_i32_0 : i32, i32
  }
  func.func @transform_3(%arg0: i32) -> (i32, i32) {
    %c0_i32 = arith.constant 0 : i32
    %c0_i32_0 = arith.constant 0 : i32
    %c0_i32_1 = arith.constant 0 : i32
    return %c0_i32, %c0_i32_0 : i32, i32
  }
  func.func @transform_4(%arg0: i32) -> (i32, i32) {
    %c0_i32 = arith.constant 0 : i32
    %c0_i32_0 = arith.constant 0 : i32
    %c0_i32_1 = arith.constant 0 : i32
    return %c0_i32, %c0_i32_0 : i32, i32
  }
  func.func @transform_5(%arg0: i32) -> (i32, i32) {
    %c0_i32 = arith.constant 0 : i32
    %c0_i32_0 = arith.constant 0 : i32
    %c0_i32_1 = arith.constant 0 : i32
    return %c0_i32, %c0_i32_0 : i32, i32
  }
  func.func @transform_6(%arg0: i32) -> (i32, i32) {
    %c0_i32 = arith.constant 0 : i32
    %c0_i32_0 = arith.constant 0 : i32
    %c0_i32_1 = arith.constant 0 : i32
    return %c0_i32, %c0_i32_0 : i32, i32
  }
  func.func @transform_7(%arg0: i32) -> (i32, i32) {
    %c0_i32 = arith.constant 0 : i32
    %c0_i32_0 = arith.constant 0 : i32
    return %arg0, %c0_i32 : i32, i32
  }
}

module attributes {stable_mosaic.version = 11 : i64} {
  func.func @_ssm_block_kernel(%arg0: i32, %arg1: memref<16x128xf32, #tpu.memory_space<vmem>>, %arg2: memref<128x128xf32, #tpu.memory_space<vmem>>, %arg3: memref<1x128xf32, #tpu.memory_space<vmem>>, %arg4: memref<128x128xf32, #tpu.memory_space<vmem>>, %arg5: memref<1x128xf32, #tpu.memory_space<vmem>>, %arg6: memref<128x128xf32, #tpu.memory_space<vmem>>, %arg7: memref<128x128xf32, #tpu.memory_space<vmem>>, %arg8: memref<16x128xf32, #tpu.memory_space<vmem>>) attributes {dimension_semantics = [#tpu.dimension_semantics<parallel>], iteration_bounds = array<i64: 1>, scalar_prefetch = 0 : i64, scratch_operands = 0 : i64, tpu.core_type = #tpu.core_type<tc>, window_params = [{transform_indices = @transform_0, window_bounds = array<i64: 16, 128>}, {pipeline_mode = #tpu.pipeline_mode<synchronous>, transform_indices = @transform_1, window_bounds = array<i64: 128, 128>}, {pipeline_mode = #tpu.pipeline_mode<synchronous>, transform_indices = @transform_2, window_bounds = array<i64: 1, 128>}, {pipeline_mode = #tpu.pipeline_mode<synchronous>, transform_indices = @transform_3, window_bounds = array<i64: 128, 128>}, {pipeline_mode = #tpu.pipeline_mode<synchronous>, transform_indices = @transform_4, window_bounds = array<i64: 1, 128>}, {pipeline_mode = #tpu.pipeline_mode<synchronous>, transform_indices = @transform_5, window_bounds = array<i64: 128, 128>}, {pipeline_mode = #tpu.pipeline_mode<synchronous>, transform_indices = @transform_6, window_bounds = array<i64: 128, 128>}, {transform_indices = @transform_7, window_bounds = array<i64: 16, 128>}]} {
    %c0 = arith.constant 0 : index
    %c0_0 = arith.constant 0 : index
    %0 = vector.load %arg1[%c0, %c0_0] : memref<16x128xf32, #tpu.memory_space<vmem>>, vector<16x128xf32>
    %cst = arith.constant dense<0.000000e+00> : vector<16xf32>
    %1 = vector.multi_reduction <add>, %0, %cst [1] : vector<16x128xf32> to vector<16xf32>
    %2 = vector.shape_cast %1 : vector<16xf32> to vector<16x1xf32>
    %3 = arith.mulf %0, %0 : vector<16x128xf32>
    %cst_1 = arith.constant dense<0.000000e+00> : vector<16xf32>
    %4 = vector.multi_reduction <add>, %3, %cst_1 [1] : vector<16x128xf32> to vector<16xf32>
    %5 = vector.shape_cast %4 : vector<16xf32> to vector<16x1xf32>
    %cst_2 = arith.constant 3.125000e-02 : f32
    %6 = vector.broadcast %cst_2 : f32 to vector<16x1xf32>
    %7 = arith.mulf %2, %6 : vector<16x1xf32>
    %cst_3 = arith.constant 3.125000e-02 : f32
    %8 = vector.broadcast %cst_3 : f32 to vector<16x1xf32>
    %9 = arith.mulf %5, %8 : vector<16x1xf32>
    %10 = arith.mulf %7, %7 : vector<16x1xf32>
    %11 = arith.subf %9, %10 : vector<16x1xf32>
    %12 = vector.broadcast %7 : vector<16x1xf32> to vector<16x128xf32>
    %13 = arith.subf %0, %12 : vector<16x128xf32>
    %cst_4 = arith.constant 9.99999974E-6 : f32
    %14 = vector.broadcast %cst_4 : f32 to vector<16x1xf32>
    %15 = arith.addf %11, %14 : vector<16x1xf32>
    %16 = math.rsqrt %15 : vector<16x1xf32>
    %17 = vector.broadcast %16 : vector<16x1xf32> to vector<16x128xf32>
    %18 = arith.mulf %13, %17 : vector<16x128xf32>
    %c0_5 = arith.constant 0 : index
    %c0_6 = arith.constant 0 : index
    %19 = vector.load %arg2[%c0_5, %c0_6] : memref<128x128xf32, #tpu.memory_space<vmem>>, vector<128x128xf32>
    %cst_7 = arith.constant dense<0.000000e+00> : vector<16x128xf32>
    %20 = tpu.matmul %18, %19, %cst_7 {dimension_numbers = #tpu.dot_dimension_numbers<[1], [0], [0], [1], [0, 0, 1, 1], [], []>} : vector<16x128xf32>, vector<128x128xf32>, vector<16x128xf32> -> vector<16x128xf32>
    %c0_8 = arith.constant 0 : index
    %c0_9 = arith.constant 0 : index
    %21 = vector.load %arg3[%c0_8, %c0_9] : memref<1x128xf32, #tpu.memory_space<vmem>>, vector<1x128xf32>
    %22 = vector.broadcast %21 : vector<1x128xf32> to vector<16x128xf32>
    %23 = arith.addf %20, %22 : vector<16x128xf32>
    %c0_10 = arith.constant 0 : index
    %c0_11 = arith.constant 0 : index
    %24 = vector.load %arg4[%c0_10, %c0_11] : memref<128x128xf32, #tpu.memory_space<vmem>>, vector<128x128xf32>
    %cst_12 = arith.constant dense<0.000000e+00> : vector<16x128xf32>
    %25 = tpu.matmul %18, %24, %cst_12 {dimension_numbers = #tpu.dot_dimension_numbers<[1], [0], [0], [1], [0, 0, 1, 1], [], []>} : vector<16x128xf32>, vector<128x128xf32>, vector<16x128xf32> -> vector<16x128xf32>
    %c0_13 = arith.constant 0 : index
    %c0_14 = arith.constant 0 : index
    %26 = vector.load %arg5[%c0_13, %c0_14] : memref<1x128xf32, #tpu.memory_space<vmem>>, vector<1x128xf32>
    %27 = vector.broadcast %26 : vector<1x128xf32> to vector<16x128xf32>
    %28 = arith.addf %25, %27 : vector<16x128xf32>
    %c0_15 = arith.constant 0 : index
    %c0_16 = arith.constant 0 : index
    %29 = vector.load %arg6[%c0_15, %c0_16] : memref<128x128xf32, #tpu.memory_space<vmem>>, vector<128x128xf32>
    %cst_17 = arith.constant dense<0.000000e+00> : vector<16x128xf32>
    %30 = tpu.matmul %23, %29, %cst_17 {dimension_numbers = #tpu.dot_dimension_numbers<[1], [0], [0], [1], [0, 0, 1, 1], [], []>} : vector<16x128xf32>, vector<128x128xf32>, vector<16x128xf32> -> vector<16x128xf32>
    %31 = arith.negf %28 : vector<16x128xf32>
    %32 = math.exp %31 : vector<16x128xf32>
    %cst_18 = arith.constant 1.000000e+00 : f32
    %33 = vector.broadcast %cst_18 : f32 to vector<16x128xf32>
    %34 = arith.addf %33, %32 : vector<16x128xf32>
    %35 = arith.divf %33, %34 : vector<16x128xf32>
    %36 = arith.mulf %28, %35 : vector<16x128xf32>
    %37 = arith.mulf %30, %36 : vector<16x128xf32>
    %c0_19 = arith.constant 0 : index
    %c0_20 = arith.constant 0 : index
    %38 = vector.load %arg7[%c0_19, %c0_20] : memref<128x128xf32, #tpu.memory_space<vmem>>, vector<128x128xf32>
    %cst_21 = arith.constant dense<0.000000e+00> : vector<16x128xf32>
    %39 = tpu.matmul %37, %38, %cst_21 {dimension_numbers = #tpu.dot_dimension_numbers<[1], [0], [0], [1], [0, 0, 1, 1], [], []>} : vector<16x128xf32>, vector<128x128xf32>, vector<16x128xf32> -> vector<16x128xf32>
    %40 = arith.addf %0, %39 : vector<16x128xf32>
    %c0_22 = arith.constant 0 : index
    %c0_23 = arith.constant 0 : index
    %41 = vector.load %arg8[%c0_22, %c0_23] : memref<16x128xf32, #tpu.memory_space<vmem>>, vector<16x128xf32>
    tpu.vector_store %arg8[%c0_22, %c0_23], %40 {strides = array<i32>} : memref<16x128xf32, #tpu.memory_space<vmem>>, vector<16x128xf32>,
    return
  }
  func.func @transform_0(%arg0: i32) -> (i32, i32) {
    %c0_i32 = arith.constant 0 : i32
    %c0_i32_0 = arith.constant 0 : i32
    return %arg0, %c0_i32 : i32, i32
  }
  func.func @transform_1(%arg0: i32) -> (i32, i32) {
    %c0_i32 = arith.constant 0 : i32
    %c0_i32_0 = arith.constant 0 : i32
    %c0_i32_1 = arith.constant 0 : i32
    return %c0_i32, %c0_i32_0 : i32, i32
  }
  func.func @transform_2(%arg0: i32) -> (i32, i32) {
    %c0_i32 = arith.constant 0 : i32
    %c0_i32_0 = arith.constant 0 : i32
    %c0_i32_1 = arith.constant 0 : i32
    return %c0_i32, %c0_i32_0 : i32, i32
  }
  func.func @transform_3(%arg0: i32) -> (i32, i32) {
    %c0_i32 = arith.constant 0 : i32
    %c0_i32_0 = arith.constant 0 : i32
    %c0_i32_1 = arith.constant 0 : i32
    return %c0_i32, %c0_i32_0 : i32, i32
  }
  func.func @transform_4(%arg0: i32) -> (i32, i32) {
    %c0_i32 = arith.constant 0 : i32
    %c0_i32_0 = arith.constant 0 : i32
    %c0_i32_1 = arith.constant 0 : i32
    return %c0_i32, %c0_i32_0 : i32, i32
  }
  func.func @transform_5(%arg0: i32) -> (i32, i32) {
    %c0_i32 = arith.constant 0 : i32
    %c0_i32_0 = arith.constant 0 : i32
    %c0_i32_1 = arith.constant 0 : i32
    return %c0_i32, %c0_i32_0 : i32, i32
  }
  func.func @transform_6(%arg0: i32) -> (i32, i32) {
    %c0_i32 = arith.constant 0 : i32
    %c0_i32_0 = arith.constant 0 : i32
    %c0_i32_1 = arith.constant 0 : i32
    return %c0_i32, %c0_i32_0 : i32, i32
  }
  func.func @transform_7(%arg0: i32) -> (i32, i32) {
    %c0_i32 = arith.constant 0 : i32
    %c0_i32_0 = arith.constant 0 : i32
    return %arg0, %c0_i32 : i32, i32
  }
}

</mosaic_0001>

<bundles_post_ra>
// kernel: selective_ssm_block.1
= control target key start
LH: loop header
LB: loop body
LE: loop exit
PB: predicated region body
PF: predicated region fallthrough
CT: control target
= control target key end

     0   :  { %s948_s0 = inlined_call_operand.vmem [shape: f32[16,128], index: 0, kind: input, shape index: {}]   ;;  %s949_s1 = inlined_call_operand.vmem [shape: f32[128,128], index: 1, kind: input, shape index: {}]   ;;  %s950_s3 = inlined_call_operand.vmem [shape: f32[128,128], index: 3, kind: input, shape index: {}]   ;;  %s951_s5 = inlined_call_operand.vmem [shape: f32[128,128], index: 5, kind: input, shape index: {}]   ;;  %s952_s6 = inlined_call_operand.vmem [shape: f32[128,128], index: 6, kind: input, shape index: {}]   ;;  %s953_s2 = inlined_call_operand.vmem [shape: f32[1,128], index: 2, kind: input, shape index: {}]   ;;  %s954_s4 = inlined_call_operand.vmem [shape: f32[1,128], index: 4, kind: input, shape index: {}]   ;;  %s955_s7 = inlined_call_operand.vmem [shape: f32[16,128], index: 7, kind: output, shape index: {}]  }
   0x1   :  { %v727_v0 = vld [vmem:[%s948_s0] sm:$0xff]  ;;  %v732_v1 = vld [vmem:[%s948_s0 + $0x8] sm:$0xff]  ;;  %v69_v2 = vld [vmem:[%s949_s1 + $0x78] sm:$0xff] }
   0x2   :  { %28 = vadd.xlane.f32.xlu0 %v727_v0  ;;  %v32_v3 = vmul.f32 %v727_v0, %v727_v0  ;;  %532 = vmatprep.subr.mxu0 %v69_v2  ;;  %v167_v4 = vld [vmem:[%s950_s3 + $0x78] sm:$0xff]  ;;  %v68_v5 = vld [vmem:[%s949_s1 + $0x70] sm:$0xff]  ;;  %v33_v7 = vmul.f32 %v732_v1, %v732_v1  ;;  %v67_v8 = vld [vmem:[%s949_s1 + $0x68] sm:$0xff] }
   0x3   :  { %v166_v6 = vld [vmem:[%s950_s3 + $0x70] sm:$0xff]  ;;  %567 = vmatprep.subr.mxu1 %v167_v4  ;;  %533 = vmatpush3.msra.mxu0 %v69_v2  ;;  %v165_v9 = vld [vmem:[%s950_s3 + $0x68] sm:$0xff]  ;;  %v66_v10 = vld [vmem:[%s949_s1 + $0x60] sm:$0xff] }
   0x4   :  { %34 = vadd.xlane.f32.xlu1 %v32_v3  ;;  %568 = vmatpush3.msra.mxu1 %v167_v4  ;;  %v164_v11 = vld [vmem:[%s950_s3 + $0x60] sm:$0xff]  ;;  %v65_v12 = vld [vmem:[%s949_s1 + $0x58] sm:$0xff]  ;;  %v64_v14 = vld [vmem:[%s949_s1 + $0x50] sm:$0xff] }
   0x5   :  { %534 = vmatprep.subr.mxu0 %v68_v5  ;;  %569 = vmatprep.subr.mxu1 %v166_v6  ;;  %v163_v13 = vld [vmem:[%s950_s3 + $0x58] sm:$0xff]  ;;  %v162_v15 = vld [vmem:[%s950_s3 + $0x50] sm:$0xff]  ;;  %v63_v16 = vld [vmem:[%s949_s1 + $0x48] sm:$0xff] }
   0x6   :  { %30 = vadd.xlane.f32.xlu0 %v732_v1  ;;  %535 = vmatpush3.msra.mxu0 %v68_v5  ;;  %v161_v17 = vld [vmem:[%s950_s3 + $0x48] sm:$0xff]  ;;  %v62_v18 = vld [vmem:[%s949_s1 + $0x40] sm:$0xff]  ;;  %v61_v20 = vld [vmem:[%s949_s1 + $0x38] sm:$0xff] }
   0x7   :  { %570 = vmatpush3.msra.mxu1 %v166_v6  ;;  %536 = vmatprep.subr.mxu0 %v67_v8  ;;  %v160_v19 = vld [vmem:[%s950_s3 + $0x40] sm:$0xff]  ;;  %v159_v21 = vld [vmem:[%s950_s3 + $0x38] sm:$0xff]  ;;  %v60_v22 = vld [vmem:[%s949_s1 + $0x30] sm:$0xff] }
   0x8   :  { %36 = vadd.xlane.f32.xlu1 %v33_v7  ;;  %571 = vmatprep.subr.mxu1 %v165_v9  ;;  %v158_v23 = vld [vmem:[%s950_s3 + $0x30] sm:$0xff]  ;;  %v59_v24 = vld [vmem:[%s949_s1 + $0x28] sm:$0xff]  ;;  %v58_v26 = vld [vmem:[%s949_s1 + $0x20] sm:$0xff] }
   0x9   :  { %537 = vmatpush3.msra.mxu0 %v67_v8  ;;  %572 = vmatpush3.msra.mxu1 %v165_v9  ;;  %v157_v25 = vld [vmem:[%s950_s3 + $0x28] sm:$0xff]  ;;  %v156_v27 = vld [vmem:[%s950_s3 + $0x20] sm:$0xff]  ;;  %v57_v28 = vld [vmem:[%s949_s1 + $0x18] sm:$0xff] }
   0xa   :  { %538 = vmatprep.subr.mxu0 %v66_v10  ;;  %573 = vmatprep.subr.mxu1 %v164_v11  ;;  %v155_v29 = vld [vmem:[%s950_s3 + $0x18] sm:$0xff]  ;;  %v56_v30 = vld [vmem:[%s949_s1 + $0x10] sm:$0xff]  ;;  %v55_v32 = vld [vmem:[%s949_s1 + $0x8] sm:$0xff] }
   0xb   :  { %539 = vmatpush3.msra.mxu0 %v66_v10  ;;  %574 = vmatpush3.msra.mxu1 %v164_v11  ;;  %v154_v31 = vld [vmem:[%s950_s3 + $0x10] sm:$0xff]  ;;  %v153_v33 = vld [vmem:[%s950_s3 + $0x8] sm:$0xff]  ;;  %v54_v34 = vld [vmem:[%s949_s1] sm:$0xff] }
   0xc   :  { %540 = vmatprep.subr.mxu0 %v65_v12  ;;  %575 = vmatprep.subr.mxu1 %v163_v13  ;;  %v152_v35 = vld [vmem:[%s950_s3] sm:$0xff]  ;;  %v265_v36 = vld [vmem:[%s951_s5 + $0x78] sm:$0xff]  ;;  %v264_v57 = vld [vmem:[%s951_s5 + $0x70] sm:$0xff] }
   0xd   :  { %541 = vmatpush3.msra.mxu0 %v65_v12  ;;  %576 = vmatpush3.msra.mxu1 %v163_v13  ;;  %v263_v58 = vld [vmem:[%s951_s5 + $0x68] sm:$0xff]  ;;  %v262_v59 = vld [vmem:[%s951_s5 + $0x60] sm:$0xff]  ;;  %v261_v60 = vld [vmem:[%s951_s5 + $0x58] sm:$0xff] }
   0xe   :  { %542 = vmatprep.subr.mxu0 %v64_v14  ;;  %577 = vmatprep.subr.mxu1 %v162_v15  ;;  %v260_v61 = vld [vmem:[%s951_s5 + $0x50] sm:$0xff]  ;;  %v259_v62 = vld [vmem:[%s951_s5 + $0x48] sm:$0xff]  ;;  %v258_v63 = vld [vmem:[%s951_s5 + $0x40] sm:$0xff] }
   0xf   :  { %543 = vmatpush3.msra.mxu0 %v64_v14  ;;  %578 = vmatpush3.msra.mxu1 %v162_v15  ;;  %v257_v2 = vld [vmem:[%s951_s5 + $0x38] sm:$0xff]  ;;  %v256_v3 = vld [vmem:[%s951_s5 + $0x30] sm:$0xff]  ;;  %v255_v4 = vld [vmem:[%s951_s5 + $0x28] sm:$0xff] }
  0x10   :  { %544 = vmatprep.subr.mxu0 %v63_v16  ;;  %579 = vmatprep.subr.mxu1 %v161_v17  ;;  %v254_v5 = vld [vmem:[%s951_s5 + $0x20] sm:$0xff]  ;;  %v253_v6 = vld [vmem:[%s951_s5 + $0x18] sm:$0xff]  ;;  %v252_v7 = vld [vmem:[%s951_s5 + $0x10] sm:$0xff] }
  0x11   :  { %545 = vmatpush3.msra.mxu0 %v63_v16  ;;  %580 = vmatpush3.msra.mxu1 %v161_v17  ;;  %v251_v8 = vld [vmem:[%s951_s5 + $0x8] sm:$0xff]  ;;  %v250_v9 = vld [vmem:[%s951_s5] sm:$0xff]  ;;  %v372_v10 = vld [vmem:[%s952_s6 + $0x78] sm:$0xff] }
  0x12   :  { %546 = vmatprep.subr.mxu0 %v62_v18  ;;  %581 = vmatprep.subr.mxu1 %v160_v19  ;;  %v371_v11 = vld [vmem:[%s952_s6 + $0x70] sm:$0xff]  ;;  %v370_v12 = vld [vmem:[%s952_s6 + $0x68] sm:$0xff]  ;;  %v369_v13 = vld [vmem:[%s952_s6 + $0x60] sm:$0xff] }
  0x13   :  { %547 = vmatpush3.msra.mxu0 %v62_v18  ;;  %582 = vmatpush3.msra.mxu1 %v160_v19  ;;  %v368_v14 = vld [vmem:[%s952_s6 + $0x58] sm:$0xff]  ;;  %v367_v15 = vld [vmem:[%s952_s6 + $0x50] sm:$0xff]  ;;  %v366_v16 = vld [vmem:[%s952_s6 + $0x48] sm:$0xff] }
  0x14   :  { %548 = vmatprep.subr.mxu0 %v61_v20  ;;  %583 = vmatprep.subr.mxu1 %v159_v21  ;;  %v365_v17 = vld [vmem:[%s952_s6 + $0x40] sm:$0xff]  ;;  %v364_v18 = vld [vmem:[%s952_s6 + $0x38] sm:$0xff]  ;;  %v363_v19 = vld [vmem:[%s952_s6 + $0x30] sm:$0xff] }
  0x15   :  { %549 = vmatpush3.msra.mxu0 %v61_v20  ;;  %584 = vmatpush3.msra.mxu1 %v159_v21  ;;  %v362_v20 = vld [vmem:[%s952_s6 + $0x28] sm:$0xff]  ;;  %v361_v21 = vld [vmem:[%s952_s6 + $0x20] sm:$0xff] }
  0x16   :  { %550 = vmatprep.subr.mxu0 %v60_v22  ;;  %585 = vmatprep.subr.mxu1 %v158_v23 }
  0x17   :  { %551 = vmatpush3.msra.mxu0 %v60_v22  ;;  %586 = vmatpush3.msra.mxu1 %v158_v23  ;;  %v360_v22 = vld [vmem:[%s952_s6 + $0x18] sm:$0xff] }
  0x18   :  { %552 = vmatprep.subr.mxu0 %v59_v24  ;;  %587 = vmatprep.subr.mxu1 %v157_v25 }
  0x19   :  { %553 = vmatpush3.msra.mxu0 %v59_v24  ;;  %588 = vmatpush3.msra.mxu1 %v157_v25  ;;  %v456_v24 = vld [vmem:[%s953_s2] ss:$0 sm:$0xff] }
  0x1a   :  { %554 = vmatprep.subr.mxu0 %v58_v26  ;;  %589 = vmatprep.subr.mxu1 %v156_v27 }
  0x1b   :  { %555 = vmatpush3.msra.mxu0 %v58_v26  ;;  %590 = vmatpush3.msra.mxu1 %v156_v27 }
  0x1c   :  { %556 = vmatprep.subr.mxu0 %v57_v28  ;;  %591 = vmatprep.subr.mxu1 %v155_v29 }
  0x1d   :  { %557 = vmatpush3.msra.mxu0 %v57_v28  ;;  %592 = vmatpush3.msra.mxu1 %v155_v29  ;;  %v359_v28 = vld [vmem:[%s952_s6 + $0x10] sm:$0xff]  ;;  %v358_v29 = vld [vmem:[%s952_s6 + $0x8] sm:$0xff] }
  0x1e   :  { %558 = vmatprep.subr.mxu0 %v56_v30  ;;  %593 = vmatprep.subr.mxu1 %v154_v31 }
  0x1f   :  { %559 = vmatpush3.msra.mxu0 %v56_v30  ;;  %594 = vmatpush3.msra.mxu1 %v154_v31  ;;  %v357_v30 = vld [vmem:[%s952_s6] sm:$0xff] }
  0x20   :  { %560 = vmatprep.subr.mxu0 %v55_v32  ;;  %595 = vmatprep.subr.mxu1 %v153_v33 }
  0x21   :  { %561 = vmatpush3.msra.mxu0 %v55_v32  ;;  %596 = vmatpush3.msra.mxu1 %v153_v33  ;;  %v457_v33 = vld [vmem:[%s954_s4] ss:$0 sm:$0xff] }
  0x22   :  { %562 = vmatprep.subr.mxu0 %v54_v34  ;;  %597 = vmatprep.subr.mxu1 %v152_v35 }
  0x23   :  { %563 = vmatpush3.msra.mxu0 %v54_v34  ;;  %598 = vmatpush3.msra.mxu1 %v152_v35 }
  0x24   :  { %602 = vmatprep.subr.mxu0 %v265_v36  ;;  %637 = vmatprep.subr.mxu1 %v372_v10 }
  0x8b   :  { %v29_v37 = vpop.xlane.xlu0 %28 }
  0x8c   :  { %v38_v38 = vmul.f32 0.03125, %v29_v37 }
  0x8d   :  { %v35_v39 = vpop.xlane.xlu1 %34 }
  0x8e   :  { %v42_v40 = vmul.f32 %v38_v38, %v38_v38  ;;  %v40_v41 = vmul.f32 0.03125, %v35_v39  ;;  %v46_v51 = vsub.f32 %v727_v0, %v38_v38 }
  0x8f   :  { %v31_v42 = vpop.xlane.xlu0 %30 }
  0x90   :  { %v44_v43 = vsub.f32 %v40_v41, %v42_v40  ;;  %v39_v44 = vmul.f32 0.03125, %v31_v42 }
  0x91   :  { %v37_v45 = vpop.xlane.xlu1 %36 }
  0x92   :  { %v48_v46 = vadd.f32 1e-05, %v44_v43  ;;  %v43_v47 = vmul.f32 %v39_v44, %v39_v44  ;;  %v41_v48 = vmul.f32 0.03125, %v37_v45  ;;  %v47_v54 = vsub.f32 %v732_v1, %v39_v44 }
  0x94   :  { %672 = vrsqrt.f32 %v48_v46  ;;  %v45_v49 = vsub.f32 %v41_v48, %v43_v47 }
  0x96   :  { %v49_v50 = vadd.f32 1e-05, %v45_v49 }
  0x98   :  { %674 = vrsqrt.f32 %v49_v50 }
  0xa1   :  { %v673_v52 = vpop.eup %672 }
  0xa2   :  { %v52_v53 = vmul.f32 %v673_v52, %v46_v51 }
  0xa4   :  { %564 = vmatprep.mubr.f32.mxu0 %v52_v53  ;;  %599 = vmatprep.mubr.f32.mxu1 %v52_v53 }
  0xa5   :  { %v675_v55 = vpop.eup %674 }
  0xa6   :  { %v53_v56 = vmul.f32 %v675_v55, %v47_v54 }
  0xa8   :  { %565 = vmatmul.mubr.f32.vlgmr.msra.gmra.mxu0 %v53_v56  ;;  %600 = vmatmul.mubr.f32.vlgmr.msra.gmra.mxu1 %v53_v56 }
  0xa9   :  { %603 = vmatpush3.msra.mxu0 %v265_v36  ;;  %638 = vmatpush3.msra.mxu1 %v372_v10 }
  0xaa   :  { %604 = vmatprep.subr.mxu0 %v264_v57  ;;  %639 = vmatprep.subr.mxu1 %v371_v11 }
  0xab   :  { %605 = vmatpush3.msra.mxu0 %v264_v57  ;;  %640 = vmatpush3.msra.mxu1 %v371_v11 }
  0xac   :  { %606 = vmatprep.subr.mxu0 %v263_v58  ;;  %641 = vmatprep.subr.mxu1 %v370_v12 }
  0xad   :  { %607 = vmatpush3.msra.mxu0 %v263_v58  ;;  %642 = vmatpush3.msra.mxu1 %v370_v12 }
  0xae   :  { %608 = vmatprep.subr.mxu0 %v262_v59  ;;  %643 = vmatprep.subr.mxu1 %v369_v13 }
  0xaf   :  { %609 = vmatpush3.msra.mxu0 %v262_v59  ;;  %644 = vmatpush3.msra.mxu1 %v369_v13 }
  0xb0   :  { %610 = vmatprep.subr.mxu0 %v261_v60  ;;  %645 = vmatprep.subr.mxu1 %v368_v14 }
  0xb1   :  { %611 = vmatpush3.msra.mxu0 %v261_v60  ;;  %646 = vmatpush3.msra.mxu1 %v368_v14 }
  0xb2   :  { %612 = vmatprep.subr.mxu0 %v260_v61  ;;  %647 = vmatprep.subr.mxu1 %v367_v15 }
  0xb3   :  { %613 = vmatpush3.msra.mxu0 %v260_v61  ;;  %648 = vmatpush3.msra.mxu1 %v367_v15 }
  0xb4   :  { %614 = vmatprep.subr.mxu0 %v259_v62  ;;  %649 = vmatprep.subr.mxu1 %v366_v16 }
  0xb5   :  { %615 = vmatpush3.msra.mxu0 %v259_v62  ;;  %650 = vmatpush3.msra.mxu1 %v366_v16 }
  0xb6   :  { %616 = vmatprep.subr.mxu0 %v258_v63  ;;  %651 = vmatprep.subr.mxu1 %v365_v17 }
  0xb7   :  { %617 = vmatpush3.msra.mxu0 %v258_v63  ;;  %652 = vmatpush3.msra.mxu1 %v365_v17 }
  0xb8   :  { %618 = vmatprep.subr.mxu0 %v257_v2  ;;  %653 = vmatprep.subr.mxu1 %v364_v18 }
  0xb9   :  { %619 = vmatpush3.msra.mxu0 %v257_v2  ;;  %654 = vmatpush3.msra.mxu1 %v364_v18 }
  0xba   :  { %620 = vmatprep.subr.mxu0 %v256_v3  ;;  %655 = vmatprep.subr.mxu1 %v363_v19 }
  0xbb   :  { %621 = vmatpush3.msra.mxu0 %v256_v3  ;;  %656 = vmatpush3.msra.mxu1 %v363_v19 }
  0xbc   :  { %622 = vmatprep.subr.mxu0 %v255_v4  ;;  %657 = vmatprep.subr.mxu1 %v362_v20 }
  0xbd   :  { %623 = vmatpush3.msra.mxu0 %v255_v4  ;;  %658 = vmatpush3.msra.mxu1 %v362_v20 }
  0xbe   :  { %624 = vmatprep.subr.mxu0 %v254_v5  ;;  %659 = vmatprep.subr.mxu1 %v361_v21 }
  0xbf   :  { %625 = vmatpush3.msra.mxu0 %v254_v5  ;;  %660 = vmatpush3.msra.mxu1 %v361_v21 }
  0xc0   :  { %626 = vmatprep.subr.mxu0 %v253_v6  ;;  %661 = vmatprep.subr.mxu1 %v360_v22 }
  0xc1   :  { %627 = vmatpush3.msra.mxu0 %v253_v6  ;;  %662 = vmatpush3.msra.mxu1 %v360_v22 }
  0xc2   :  { %628 = vmatprep.subr.mxu0 %v252_v7  ;;  %663 = vmatprep.subr.mxu1 %v359_v28 }
  0xc3   :  { %629 = vmatpush3.msra.mxu0 %v252_v7  ;;  %664 = vmatpush3.msra.mxu1 %v359_v28 }
  0xc4   :  { %630 = vmatprep.subr.mxu0 %v251_v8  ;;  %665 = vmatprep.subr.mxu1 %v358_v29 }
  0xc5   :  { %631 = vmatpush3.msra.mxu0 %v251_v8  ;;  %666 = vmatpush3.msra.mxu1 %v358_v29 }
  0xc6   :  { %632 = vmatprep.subr.mxu0 %v250_v9  ;;  %667 = vmatprep.subr.mxu1 %v357_v30 }
  0xc7   :  { %633 = vmatpush3.msra.mxu0 %v250_v9  ;;  %668 = vmatpush3.msra.mxu1 %v357_v30 }
 0x168   :  { %v566_v23 = vpop.f32.mrf.mxu0  ;;  %v601_v31 = vpop.f32.mrf.mxu1 }
 0x169   :  { %v149_v27 = vadd.f32 %v566_v23, %v456_v24  ;;  %v247_v35 = vadd.f32 %v601_v31, %v457_v33 }
 0x16a   :  { %v143_v25 = vpop.f32.mrf.mxu0  ;;  %v241_v32 = vpop.f32.mrf.mxu1 }
 0x16b   :  { %v144_v26 = vadd.f32 %v456_v24, %v143_v25  ;;  %v242_v34 = vadd.f32 %v457_v33, %v241_v32  ;;  %v459_v37 = vmul.f32 -1.442695, %v247_v35 }
 0x16d   :  { %634 = vmatprep.mubr.f32.mxu0 %v144_v26  ;;  %v458_v36 = vmul.f32 -1.442695, %v242_v34 }
 0x16e   :  { %635 = vmatmul.mubr.f32.vlgmr.msra.gmra.mxu0 %v149_v27 }
 0x16f   :  { %676 = vpow2.f32 %v458_v36 }
 0x170   :  { %678 = vpow2.f32 %v459_v37 }
 0x17c   :  { %v677_v38 = vpop.eup %676 }
 0x17d   :  { %v679_v39 = vpop.eup %678  ;;  %v347_v40 = vadd.f32 1.0, %v677_v38 }
 0x17e   :  { %v348_v41 = vadd.f32 1.0, %v679_v39 }
 0x17f   :  { %680 = vrcp.f32 %v347_v40 }
 0x180   :  { %682 = vrcp.f32 %v348_v41 }
 0x18c   :  { %v681_v42 = vpop.eup %680 }
 0x18d   :  { %v683_v43 = vpop.eup %682  ;;  %v353_v45 = vmul.f32 %v681_v42, %v242_v34 }
 0x18e   :  { %v354_v46 = vmul.f32 %v683_v43, %v247_v35 }
 0x22e   :  { %v636_v44 = vpop.f32.mrf.mxu0 }
 0x22f   :  { %v356_v49 = vmul.f32 %v636_v44, %v354_v46 }
 0x230   :  { %v332_v47 = vpop.f32.mrf.mxu0 }
 0x231   :  { %v355_v48 = vmul.f32 %v353_v45, %v332_v47 }
 0x233   :  { %669 = vmatprep.mubr.f32.mxu1 %v355_v48 }
 0x234   :  { %670 = vmatmul.mubr.f32.vlgmr.msra.gmra.mxu1 %v356_v49 }
 0x2f4   :  { %v671_v50 = vpop.f32.mrf.mxu1 }
 0x2f5   :  { %v449_v51 = vadd.f32 %v671_v50, %v732_v1 }
 0x2f6   :  { %v439_v52 = vpop.f32.mrf.mxu1 }
 0x2f7   :  { %451 = vst [vmem:[%s955_s7 + $0x8] sm:$0xff] %v449_v51  ;;  %v448_v53 = vadd.f32 %v439_v52, %v727_v0 }
 0x2f9   :  { %450 = vst [vmem:[%s955_s7] sm:$0xff] %v448_v53 }

// kernel: selective_ssm_block.1
= control target key start
LH: loop header
LB: loop body
LE: loop exit
PB: predicated region body
PF: predicated region fallthrough
CT: control target
= control target key end

     0   :  { %s948_s0 = inlined_call_operand.vmem [shape: f32[16,128], index: 0, kind: input, shape index: {}]   ;;  %s949_s1 = inlined_call_operand.vmem [shape: f32[128,128], index: 1, kind: input, shape index: {}]   ;;  %s950_s3 = inlined_call_operand.vmem [shape: f32[128,128], index: 3, kind: input, shape index: {}]   ;;  %s951_s5 = inlined_call_operand.vmem [shape: f32[128,128], index: 5, kind: input, shape index: {}]   ;;  %s952_s6 = inlined_call_operand.vmem [shape: f32[128,128], index: 6, kind: input, shape index: {}]   ;;  %s953_s2 = inlined_call_operand.vmem [shape: f32[1,128], index: 2, kind: input, shape index: {}]   ;;  %s954_s4 = inlined_call_operand.vmem [shape: f32[1,128], index: 4, kind: input, shape index: {}]   ;;  %s955_s7 = inlined_call_operand.vmem [shape: f32[16,128], index: 7, kind: output, shape index: {}]  }
   0x1   :  { %v727_v0 = vld [vmem:[%s948_s0] sm:$0xff]  ;;  %v732_v1 = vld [vmem:[%s948_s0 + $0x8] sm:$0xff]  ;;  %v69_v2 = vld [vmem:[%s949_s1 + $0x78] sm:$0xff] }
   0x2   :  { %28 = vadd.xlane.f32.xlu0 %v727_v0  ;;  %v32_v3 = vmul.f32 %v727_v0, %v727_v0  ;;  %532 = vmatprep.subr.mxu0 %v69_v2  ;;  %v167_v4 = vld [vmem:[%s950_s3 + $0x78] sm:$0xff]  ;;  %v68_v5 = vld [vmem:[%s949_s1 + $0x70] sm:$0xff]  ;;  %v33_v7 = vmul.f32 %v732_v1, %v732_v1  ;;  %v67_v8 = vld [vmem:[%s949_s1 + $0x68] sm:$0xff] }
   0x3   :  { %v166_v6 = vld [vmem:[%s950_s3 + $0x70] sm:$0xff]  ;;  %567 = vmatprep.subr.mxu1 %v167_v4  ;;  %533 = vmatpush3.msra.mxu0 %v69_v2  ;;  %v165_v9 = vld [vmem:[%s950_s3 + $0x68] sm:$0xff]  ;;  %v66_v10 = vld [vmem:[%s949_s1 + $0x60] sm:$0xff] }
   0x4   :  { %34 = vadd.xlane.f32.xlu1 %v32_v3  ;;  %568 = vmatpush3.msra.mxu1 %v167_v4  ;;  %v164_v11 = vld [vmem:[%s950_s3 + $0x60] sm:$0xff]  ;;  %v65_v12 = vld [vmem:[%s949_s1 + $0x58] sm:$0xff]  ;;  %v64_v14 = vld [vmem:[%s949_s1 + $0x50] sm:$0xff] }
   0x5   :  { %534 = vmatprep.subr.mxu0 %v68_v5  ;;  %569 = vmatprep.subr.mxu1 %v166_v6  ;;  %v163_v13 = vld [vmem:[%s950_s3 + $0x58] sm:$0xff]  ;;  %v162_v15 = vld [vmem:[%s950_s3 + $0x50] sm:$0xff]  ;;  %v63_v16 = vld [vmem:[%s949_s1 + $0x48] sm:$0xff] }
   0x6   :  { %30 = vadd.xlane.f32.xlu0 %v732_v1  ;;  %535 = vmatpush3.msra.mxu0 %v68_v5  ;;  %v161_v17 = vld [vmem:[%s950_s3 + $0x48] sm:$0xff]  ;;  %v62_v18 = vld [vmem:[%s949_s1 + $0x40] sm:$0xff]  ;;  %v61_v20 = vld [vmem:[%s949_s1 + $0x38] sm:$0xff] }
   0x7   :  { %570 = vmatpush3.msra.mxu1 %v166_v6  ;;  %536 = vmatprep.subr.mxu0 %v67_v8  ;;  %v160_v19 = vld [vmem:[%s950_s3 + $0x40] sm:$0xff]  ;;  %v159_v21 = vld [vmem:[%s950_s3 + $0x38] sm:$0xff]  ;;  %v60_v22 = vld [vmem:[%s949_s1 + $0x30] sm:$0xff] }
   0x8   :  { %36 = vadd.xlane.f32.xlu1 %v33_v7  ;;  %571 = vmatprep.subr.mxu1 %v165_v9  ;;  %v158_v23 = vld [vmem:[%s950_s3 + $0x30] sm:$0xff]  ;;  %v59_v24 = vld [vmem:[%s949_s1 + $0x28] sm:$0xff]  ;;  %v58_v26 = vld [vmem:[%s949_s1 + $0x20] sm:$0xff] }
   0x9   :  { %537 = vmatpush3.msra.mxu0 %v67_v8  ;;  %572 = vmatpush3.msra.mxu1 %v165_v9  ;;  %v157_v25 = vld [vmem:[%s950_s3 + $0x28] sm:$0xff]  ;;  %v156_v27 = vld [vmem:[%s950_s3 + $0x20] sm:$0xff]  ;;  %v57_v28 = vld [vmem:[%s949_s1 + $0x18] sm:$0xff] }
   0xa   :  { %538 = vmatprep.subr.mxu0 %v66_v10  ;;  %573 = vmatprep.subr.mxu1 %v164_v11  ;;  %v155_v29 = vld [vmem:[%s950_s3 + $0x18] sm:$0xff]  ;;  %v56_v30 = vld [vmem:[%s949_s1 + $0x10] sm:$0xff]  ;;  %v55_v32 = vld [vmem:[%s949_s1 + $0x8] sm:$0xff] }
   0xb   :  { %539 = vmatpush3.msra.mxu0 %v66_v10  ;;  %574 = vmatpush3.msra.mxu1 %v164_v11  ;;  %v154_v31 = vld [vmem:[%s950_s3 + $0x10] sm:$0xff]  ;;  %v153_v33 = vld [vmem:[%s950_s3 + $0x8] sm:$0xff]  ;;  %v54_v34 = vld [vmem:[%s949_s1] sm:$0xff] }
   0xc   :  { %540 = vmatprep.subr.mxu0 %v65_v12  ;;  %575 = vmatprep.subr.mxu1 %v163_v13  ;;  %v152_v35 = vld [vmem:[%s950_s3] sm:$0xff]  ;;  %v265_v36 = vld [vmem:[%s951_s5 + $0x78] sm:$0xff]  ;;  %v264_v57 = vld [vmem:[%s951_s5 + $0x70] sm:$0xff] }
   0xd   :  { %541 = vmatpush3.msra.mxu0 %v65_v12  ;;  %576 = vmatpush3.msra.mxu1 %v163_v13  ;;  %v263_v58 = vld [vmem:[%s951_s5 + $0x68] sm:$0xff]  ;;  %v262_v59 = vld [vmem:[%s951_s5 + $0x60] sm:$0xff]  ;;  %v261_v60 = vld [vmem:[%s951_s5 + $0x58] sm:$0xff] }
   0xe   :  { %542 = vmatprep.subr.mxu0 %v64_v14  ;;  %577 = vmatprep.subr.mxu1 %v162_v15  ;;  %v260_v61 = vld [vmem:[%s951_s5 + $0x50] sm:$0xff]  ;;  %v259_v62 = vld [vmem:[%s951_s5 + $0x48] sm:$0xff]  ;;  %v258_v63 = vld [vmem:[%s951_s5 + $0x40] sm:$0xff] }
   0xf   :  { %543 = vmatpush3.msra.mxu0 %v64_v14  ;;  %578 = vmatpush3.msra.mxu1 %v162_v15  ;;  %v257_v2 = vld [vmem:[%s951_s5 + $0x38] sm:$0xff]  ;;  %v256_v3 = vld [vmem:[%s951_s5 + $0x30] sm:$0xff]  ;;  %v255_v4 = vld [vmem:[%s951_s5 + $0x28] sm:$0xff] }
  0x10   :  { %544 = vmatprep.subr.mxu0 %v63_v16  ;;  %579 = vmatprep.subr.mxu1 %v161_v17  ;;  %v254_v5 = vld [vmem:[%s951_s5 + $0x20] sm:$0xff]  ;;  %v253_v6 = vld [vmem:[%s951_s5 + $0x18] sm:$0xff]  ;;  %v252_v7 = vld [vmem:[%s951_s5 + $0x10] sm:$0xff] }
  0x11   :  { %545 = vmatpush3.msra.mxu0 %v63_v16  ;;  %580 = vmatpush3.msra.mxu1 %v161_v17  ;;  %v251_v8 = vld [vmem:[%s951_s5 + $0x8] sm:$0xff]  ;;  %v250_v9 = vld [vmem:[%s951_s5] sm:$0xff]  ;;  %v372_v10 = vld [vmem:[%s952_s6 + $0x78] sm:$0xff] }
  0x12   :  { %546 = vmatprep.subr.mxu0 %v62_v18  ;;  %581 = vmatprep.subr.mxu1 %v160_v19  ;;  %v371_v11 = vld [vmem:[%s952_s6 + $0x70] sm:$0xff]  ;;  %v370_v12 = vld [vmem:[%s952_s6 + $0x68] sm:$0xff]  ;;  %v369_v13 = vld [vmem:[%s952_s6 + $0x60] sm:$0xff] }
  0x13   :  { %547 = vmatpush3.msra.mxu0 %v62_v18  ;;  %582 = vmatpush3.msra.mxu1 %v160_v19  ;;  %v368_v14 = vld [vmem:[%s952_s6 + $0x58] sm:$0xff]  ;;  %v367_v15 = vld [vmem:[%s952_s6 + $0x50] sm:$0xff]  ;;  %v366_v16 = vld [vmem:[%s952_s6 + $0x48] sm:$0xff] }
  0x14   :  { %548 = vmatprep.subr.mxu0 %v61_v20  ;;  %583 = vmatprep.subr.mxu1 %v159_v21  ;;  %v365_v17 = vld [vmem:[%s952_s6 + $0x40] sm:$0xff]  ;;  %v364_v18 = vld [vmem:[%s952_s6 + $0x38] sm:$0xff]  ;;  %v363_v19 = vld [vmem:[%s952_s6 + $0x30] sm:$0xff] }
  0x15   :  { %549 = vmatpush3.msra.mxu0 %v61_v20  ;;  %584 = vmatpush3.msra.mxu1 %v159_v21  ;;  %v362_v20 = vld [vmem:[%s952_s6 + $0x28] sm:$0xff]  ;;  %v361_v21 = vld [vmem:[%s952_s6 + $0x20] sm:$0xff] }
  0x16   :  { %550 = vmatprep.subr.mxu0 %v60_v22  ;;  %585 = vmatprep.subr.mxu1 %v158_v23 }
  0x17   :  { %551 = vmatpush3.msra.mxu0 %v60_v22  ;;  %586 = vmatpush3.msra.mxu1 %v158_v23  ;;  %v360_v22 = vld [vmem:[%s952_s6 + $0x18] sm:$0xff] }
  0x18   :  { %552 = vmatprep.subr.mxu0 %v59_v24  ;;  %587 = vmatprep.subr.mxu1 %v157_v25 }
  0x19   :  { %553 = vmatpush3.msra.mxu0 %v59_v24  ;;  %588 = vmatpush3.msra.mxu1 %v157_v25  ;;  %v456_v24 = vld [vmem:[%s953_s2] ss:$0 sm:$0xff] }
  0x1a   :  { %554 = vmatprep.subr.mxu0 %v58_v26  ;;  %589 = vmatprep.subr.mxu1 %v156_v27 }
  0x1b   :  { %555 = vmatpush3.msra.mxu0 %v58_v26  ;;  %590 = vmatpush3.msra.mxu1 %v156_v27 }
  0x1c   :  { %556 = vmatprep.subr.mxu0 %v57_v28  ;;  %591 = vmatprep.subr.mxu1 %v155_v29 }
  0x1d   :  { %557 = vmatpush3.msra.mxu0 %v57_v28  ;;  %592 = vmatpush3.msra.mxu1 %v155_v29  ;;  %v359_v28 = vld [vmem:[%s952_s6 + $0x10] sm:$0xff]  ;;  %v358_v29 = vld [vmem:[%s952_s6 + $0x8] sm:$0xff] }
  0x1e   :  { %558 = vmatprep.subr.mxu0 %v56_v30  ;;  %593 = vmatprep.subr.mxu1 %v154_v31 }
  0x1f   :  { %559 = vmatpush3.msra.mxu0 %v56_v30  ;;  %594 = vmatpush3.msra.mxu1 %v154_v31  ;;  %v357_v30 = vld [vmem:[%s952_s6] sm:$0xff] }
  0x20   :  { %560 = vmatprep.subr.mxu0 %v55_v32  ;;  %595 = vmatprep.subr.mxu1 %v153_v33 }
  0x21   :  { %561 = vmatpush3.msra.mxu0 %v55_v32  ;;  %596 = vmatpush3.msra.mxu1 %v153_v33  ;;  %v457_v33 = vld [vmem:[%s954_s4] ss:$0 sm:$0xff] }
  0x22   :  { %562 = vmatprep.subr.mxu0 %v54_v34  ;;  %597 = vmatprep.subr.mxu1 %v152_v35 }
  0x23   :  { %563 = vmatpush3.msra.mxu0 %v54_v34  ;;  %598 = vmatpush3.msra.mxu1 %v152_v35 }
  0x24   :  { %602 = vmatprep.subr.mxu0 %v265_v36  ;;  %637 = vmatprep.subr.mxu1 %v372_v10 }
  0x8b   :  { %v29_v37 = vpop.xlane.xlu0 %28 }
  0x8c   :  { %v38_v38 = vmul.f32 0.03125, %v29_v37 }
  0x8d   :  { %v35_v39 = vpop.xlane.xlu1 %34 }
  0x8e   :  { %v42_v40 = vmul.f32 %v38_v38, %v38_v38  ;;  %v40_v41 = vmul.f32 0.03125, %v35_v39  ;;  %v46_v51 = vsub.f32 %v727_v0, %v38_v38 }
  0x8f   :  { %v31_v42 = vpop.xlane.xlu0 %30 }
  0x90   :  { %v44_v43 = vsub.f32 %v40_v41, %v42_v40  ;;  %v39_v44 = vmul.f32 0.03125, %v31_v42 }
  0x91   :  { %v37_v45 = vpop.xlane.xlu1 %36 }
  0x92   :  { %v48_v46 = vadd.f32 1e-05, %v44_v43  ;;  %v43_v47 = vmul.f32 %v39_v44, %v39_v44  ;;  %v41_v48 = vmul.f32 0.03125, %v37_v45  ;;  %v47_v54 = vsub.f32 %v732_v1, %v39_v44 }
  0x94   :  { %672 = vrsqrt.f32 %v48_v46  ;;  %v45_v49 = vsub.f32 %v41_v48, %v43_v47 }
  0x96   :  { %v49_v50 = vadd.f32 1e-05, %v45_v49 }
  0x98   :  { %674 = vrsqrt.f32 %v49_v50 }
  0xa1   :  { %v673_v52 = vpop.eup %672 }
  0xa2   :  { %v52_v53 = vmul.f32 %v673_v52, %v46_v51 }
  0xa4   :  { %564 = vmatprep.mubr.f32.mxu0 %v52_v53  ;;  %599 = vmatprep.mubr.f32.mxu1 %v52_v53 }
  0xa5   :  { %v675_v55 = vpop.eup %674 }
  0xa6   :  { %v53_v56 = vmul.f32 %v675_v55, %v47_v54 }
  0xa8   :  { %565 = vmatmul.mubr.f32.vlgmr.msra.gmra.mxu0 %v53_v56  ;;  %600 = vmatmul.mubr.f32.vlgmr.msra.gmra.mxu1 %v53_v56 }
  0xa9   :  { %603 = vmatpush3.msra.mxu0 %v265_v36  ;;  %638 = vmatpush3.msra.mxu1 %v372_v10 }
  0xaa   :  { %604 = vmatprep.subr.mxu0 %v264_v57  ;;  %639 = vmatprep.subr.mxu1 %v371_v11 }
  0xab   :  { %605 = vmatpush3.msra.mxu0 %v264_v57  ;;  %640 = vmatpush3.msra.mxu1 %v371_v11 }
  0xac   :  { %606 = vmatprep.subr.mxu0 %v263_v58  ;;  %641 = vmatprep.subr.mxu1 %v370_v12 }
  0xad   :  { %607 = vmatpush3.msra.mxu0 %v263_v58  ;;  %642 = vmatpush3.msra.mxu1 %v370_v12 }
  0xae   :  { %608 = vmatprep.subr.mxu0 %v262_v59  ;;  %643 = vmatprep.subr.mxu1 %v369_v13 }
  0xaf   :  { %609 = vmatpush3.msra.mxu0 %v262_v59  ;;  %644 = vmatpush3.msra.mxu1 %v369_v13 }
  0xb0   :  { %610 = vmatprep.subr.mxu0 %v261_v60  ;;  %645 = vmatprep.subr.mxu1 %v368_v14 }
  0xb1   :  { %611 = vmatpush3.msra.mxu0 %v261_v60  ;;  %646 = vmatpush3.msra.mxu1 %v368_v14 }
  0xb2   :  { %612 = vmatprep.subr.mxu0 %v260_v61  ;;  %647 = vmatprep.subr.mxu1 %v367_v15 }
  0xb3   :  { %613 = vmatpush3.msra.mxu0 %v260_v61  ;;  %648 = vmatpush3.msra.mxu1 %v367_v15 }
  0xb4   :  { %614 = vmatprep.subr.mxu0 %v259_v62  ;;  %649 = vmatprep.subr.mxu1 %v366_v16 }
  0xb5   :  { %615 = vmatpush3.msra.mxu0 %v259_v62  ;;  %650 = vmatpush3.msra.mxu1 %v366_v16 }
  0xb6   :  { %616 = vmatprep.subr.mxu0 %v258_v63  ;;  %651 = vmatprep.subr.mxu1 %v365_v17 }
  0xb7   :  { %617 = vmatpush3.msra.mxu0 %v258_v63  ;;  %652 = vmatpush3.msra.mxu1 %v365_v17 }
  0xb8   :  { %618 = vmatprep.subr.mxu0 %v257_v2  ;;  %653 = vmatprep.subr.mxu1 %v364_v18 }
  0xb9   :  { %619 = vmatpush3.msra.mxu0 %v257_v2  ;;  %654 = vmatpush3.msra.mxu1 %v364_v18 }
  0xba   :  { %620 = vmatprep.subr.mxu0 %v256_v3  ;;  %655 = vmatprep.subr.mxu1 %v363_v19 }
  0xbb   :  { %621 = vmatpush3.msra.mxu0 %v256_v3  ;;  %656 = vmatpush3.msra.mxu1 %v363_v19 }
  0xbc   :  { %622 = vmatprep.subr.mxu0 %v255_v4  ;;  %657 = vmatprep.subr.mxu1 %v362_v20 }
  0xbd   :  { %623 = vmatpush3.msra.mxu0 %v255_v4  ;;  %658 = vmatpush3.msra.mxu1 %v362_v20 }
  0xbe   :  { %624 = vmatprep.subr.mxu0 %v254_v5  ;;  %659 = vmatprep.subr.mxu1 %v361_v21 }
  0xbf   :  { %625 = vmatpush3.msra.mxu0 %v254_v5  ;;  %660 = vmatpush3.msra.mxu1 %v361_v21 }
  0xc0   :  { %626 = vmatprep.subr.mxu0 %v253_v6  ;;  %661 = vmatprep.subr.mxu1 %v360_v22 }
  0xc1   :  { %627 = vmatpush3.msra.mxu0 %v253_v6  ;;  %662 = vmatpush3.msra.mxu1 %v360_v22 }
  0xc2   :  { %628 = vmatprep.subr.mxu0 %v252_v7  ;;  %663 = vmatprep.subr.mxu1 %v359_v28 }
  0xc3   :  { %629 = vmatpush3.msra.mxu0 %v252_v7  ;;  %664 = vmatpush3.msra.mxu1 %v359_v28 }
  0xc4   :  { %630 = vmatprep.subr.mxu0 %v251_v8  ;;  %665 = vmatprep.subr.mxu1 %v358_v29 }
  0xc5   :  { %631 = vmatpush3.msra.mxu0 %v251_v8  ;;  %666 = vmatpush3.msra.mxu1 %v358_v29 }
  0xc6   :  { %632 = vmatprep.subr.mxu0 %v250_v9  ;;  %667 = vmatprep.subr.mxu1 %v357_v30 }
  0xc7   :  { %633 = vmatpush3.msra.mxu0 %v250_v9  ;;  %668 = vmatpush3.msra.mxu1 %v357_v30 }
 0x168   :  { %v566_v23 = vpop.f32.mrf.mxu0  ;;  %v601_v31 = vpop.f32.mrf.mxu1 }
 0x169   :  { %v149_v27 = vadd.f32 %v566_v23, %v456_v24  ;;  %v247_v35 = vadd.f32 %v601_v31, %v457_v33 }
 0x16a   :  { %v143_v25 = vpop.f32.mrf.mxu0  ;;  %v241_v32 = vpop.f32.mrf.mxu1 }
 0x16b   :  { %v144_v26 = vadd.f32 %v456_v24, %v143_v25  ;;  %v242_v34 = vadd.f32 %v457_v33, %v241_v32  ;;  %v459_v37 = vmul.f32 -1.442695, %v247_v35 }
 0x16d   :  { %634 = vmatprep.mubr.f32.mxu0 %v144_v26  ;;  %v458_v36 = vmul.f32 -1.442695, %v242_v34 }
 0x16e   :  { %635 = vmatmul.mubr.f32.vlgmr.msra.gmra.mxu0 %v149_v27 }
 0x16f   :  { %676 = vpow2.f32 %v458_v36 }
 0x170   :  { %678 = vpow2.f32 %v459_v37 }
 0x17c   :  { %v677_v38 = vpop.eup %676 }
 0x17d   :  { %v679_v39 = vpop.eup %678  ;;  %v347_v40 = vadd.f32 1.0, %v677_v38 }
 0x17e   :  { %v348_v41 = vadd.f32 1.0, %v679_v39 }
 0x17f   :  { %680 = vrcp.f32 %v347_v40 }
 0x180   :  { %682 = vrcp.f32 %v348_v41 }
 0x18c   :  { %v681_v42 = vpop.eup %680 }
 0x18d   :  { %v683_v43 = vpop.eup %682  ;;  %v353_v45 = vmul.f32 %v681_v42, %v242_v34 }
 0x18e   :  { %v354_v46 = vmul.f32 %v683_v43, %v247_v35 }
 0x22e   :  { %v636_v44 = vpop.f32.mrf.mxu0 }
 0x22f   :  { %v356_v49 = vmul.f32 %v636_v44, %v354_v46 }
 0x230   :  { %v332_v47 = vpop.f32.mrf.mxu0 }
 0x231   :  { %v355_v48 = vmul.f32 %v353_v45, %v332_v47 }
 0x233   :  { %669 = vmatprep.mubr.f32.mxu1 %v355_v48 }
 0x234   :  { %670 = vmatmul.mubr.f32.vlgmr.msra.gmra.mxu1 %v356_v49 }
 0x2f4   :  { %v671_v50 = vpop.f32.mrf.mxu1 }
 0x2f5   :  { %v449_v51 = vadd.f32 %v671_v50, %v732_v1 }
 0x2f6   :  { %v439_v52 = vpop.f32.mrf.mxu1 }
 0x2f7   :  { %451 = vst [vmem:[%s955_s7 + $0x8] sm:$0xff] %v449_v51  ;;  %v448_v53 = vadd.f32 %v439_v52, %v727_v0 }
 0x2f9   :  { %450 = vst [vmem:[%s955_s7] sm:$0xff] %v448_v53 }

</bundles_post_ra>
